<compile_context>
chip_gen: v7x
topology: tpu7x:2x2x1
jax: 0.10.0
libtpu: 0.0.40
codegen_flags: <defaults>
</compile_context>

<pallas_src>
import jax
import jax.numpy as jnp
from jax import lax
from jax.experimental import pallas as pl
from jax.experimental.pallas import tpu as pltpu

TILE_B_MAX = 8192  # batch tile; 1 MiB raw x block at in_size=32 (f32)


def mlp_kernel(x_ref, w1_ref, w2_ref, w3_ref, b_ref, o_ref):
    # x_ref: (tile_b, in_size) — NATIVE layout, no wrapper transpose.
    # b_ref: (16+8+1, 1) packed biases, broadcast along lanes.
    n1 = w1_ref.shape[0]
    n2 = w2_ref.shape[0]

    x = x_ref[...]

    # Layer 1: contract the in_size axes of W1 (16, in) and x (tile_b, in)
    # -> (16, tile_b).  Batch ends up on the lane axis; the MXU handles the
    # transposed RHS (trans_b), f32 accumulation.
    h1 = lax.dot_general(w1_ref[...], x, (((1,), (1,)), ((), ())),
                         preferred_element_type=jnp.float32)
    h1 = jnp.maximum(h1 + b_ref[0:n1, :], 0.0)

    # Layer 2: (8, 16) @ (16, tile_b) -> (8, tile_b)
    h2 = jnp.dot(w2_ref[...], h1, preferred_element_type=jnp.float32)
    h2 = jnp.maximum(h2 + b_ref[n1:n1 + n2, :], 0.0)

    # Layer 3: (1, 8) @ (8, tile_b) -> (1, tile_b)
    z = jnp.dot(w3_ref[...], h2, preferred_element_type=jnp.float32)
    z = z + b_ref[n1 + n2:, :]

    # Numerically-stable sigmoid; tanh runs on the EUP slot (epilogue ~free).
    o_ref[...] = (0.5 * (jnp.tanh(0.5 * z) + 1.0)).astype(o_ref.dtype)


def neural_net_forward(x, params, *, tile_b_max=TILE_B_MAX):
    """x: (B, input_size) f32.  Returns (B, 1) f32 (matches the PyTorch contract)."""
    w1, b1, w2, b2, w3, b3 = params
    B, in_size = x.shape

    # Tile selection: single full-extent block for small B (no padding, no
    # alignment constraint), otherwise a lane-aligned 8192-wide tile with the
    # last (possibly partial) block masked by Pallas.
    if B <= tile_b_max:
        tile_b = B
    else:
        tile_b = tile_b_max          # multiple of 8 and 128
    num_tiles = pl.cdiv(B, tile_b)

    bias = jnp.concatenate([b1, b2, b3]).reshape(-1, 1)   # (25, 1) packed biases

    n_param = w1.size + w2.size + w3.size + bias.size
    cost = pl.CostEstimate(
        flops=2 * B * (in_size * w1.shape[0]
                       + w1.shape[0] * w2.shape[0]
                       + w2.shape[0] * w3.shape[0]),
        transcendentals=B,
        bytes_accessed=4 * (x.size + B + n_param),
    )

    # Weights/biases: one grid-invariant block, resident across all steps.
    rep = lambda a: pl.BlockSpec(a.shape, lambda i: (0, 0))

    out = pl.pallas_call(
        mlp_kernel,
        out_shape=jax.ShapeDtypeStruct((1, B), jnp.float32),
        grid=(num_tiles,),
        in_specs=[
            pl.BlockSpec((tile_b, in_size), lambda i: (i, 0)),  # native x, batch-tiled
            rep(w1), rep(w2), rep(w3), rep(bias),
        ],
        out_specs=pl.BlockSpec((1, tile_b), lambda i: (0, i)),  # lane-dense output
        compiler_params=pltpu.CompilerParams(
            # Batch tiles are independent; on v7x this lets the grid be split
            # across both TensorCores.
            # TODO(synk): try dimension_semantics=(pltpu.CORE_PARALLEL,) on v7x
            # and confirm both TCs are busy in an xprof trace.
            dimension_semantics=("parallel",),
        ),
        cost_estimate=cost,
    )(x, w1, w2, w3, bias)

    # (1, B) -> (B, 1): pure reshape (row-major order preserved), no transpose.
    return out.reshape(B, 1)


def init_params(key, input_size):
    """PyTorch-layout params; nn.Linear default init U(-1/sqrt(fan_in), 1/sqrt(fan_in))."""
    dims = [(input_size, 16), (16, 8), (8, 1)]
    params = []
    for i, (fan_in, fan_out) in enumerate(dims):
        kw, kb = jax.random.split(jax.random.fold_in(key, i))
        bound = 1.0 / (fan_in ** 0.5)
        w = jax.random.uniform(kw, (fan_out, fan_in), jnp.float32, -bound, bound)
        b = jax.random.uniform(kb, (fan_out,), jnp.float32, -bound, bound)
        params += [w, b]
    return tuple(params)


def reference_forward(x, params):
    """Plain-JAX reference (same math as the PyTorch module)."""
    w1, b1, w2, b2, w3, b3 = params
    h = jnp.maximum(x @ w1.T + b1, 0.0)
    h = jnp.maximum(h @ w2.T + b2, 0.0)
    return jax.nn.sigmoid(h @ w3.T + b3)


if __name__ == "__main__":
    key = jax.random.PRNGKey(0)
    input_size = 32
    batch = 8

    kx, kp = jax.random.split(key)
    x = jax.random.normal(kx, (batch, input_size), jnp.float32)
    params = init_params(kp, input_size)

    # Small single-tile case.
    out = jax.block_until_ready(neural_net_forward(x, params))
    ref = reference_forward(x, params)
    assert out.shape == (batch, 1), out.shape
    assert jnp.allclose(out, ref, atol=2e-5, rtol=2e-5), (out, ref)

    # Multi-tile path with a partial last block (small shapes; tile override
    # just to exercise the grid/masking path: 1500 = 2*512 + 476).
    x_big = jax.random.normal(jax.random.fold_in(kx, 1), (1500, input_size), jnp.float32)
    out_big = jax.block_until_ready(neural_net_forward(x_big, params, tile_b_max=512))
    ref_big = reference_forward(x_big, params)
    assert out_big.shape == (1500, 1), out_big.shape
    assert jnp.allclose(out_big, ref_big, atol=2e-5, rtol=2e-5)

    print("KERNEL_OK")
</pallas_src>

<mosaic_0001>
module attributes {stable_mosaic.version = 11 : i64} {
  func.func @mlp_kernel(%arg0: i32, %arg1: memref<8x32xf32, #tpu.memory_space<vmem>>, %arg2: memref<16x32xf32, #tpu.memory_space<vmem>>, %arg3: memref<8x16xf32, #tpu.memory_space<vmem>>, %arg4: memref<1x8xf32, #tpu.memory_space<vmem>>, %arg5: memref<25x1xf32, #tpu.memory_space<vmem>>, %arg6: memref<1x8xf32, #tpu.memory_space<vmem>>) attributes {dimension_semantics = [#tpu.dimension_semantics<parallel>], iteration_bounds = array<i64: 1>, scalar_prefetch = 0 : i64, scratch_operands = 0 : i64, tpu.core_type = #tpu.core_type<tc>, window_params = [{transform_indices = @transform_0, window_bounds = array<i64: 8, 32>}, {pipeline_mode = #tpu.pipeline_mode<synchronous>, transform_indices = @transform_1, window_bounds = array<i64: 16, 32>}, {pipeline_mode = #tpu.pipeline_mode<synchronous>, transform_indices = @transform_2, window_bounds = array<i64: 8, 16>}, {pipeline_mode = #tpu.pipeline_mode<synchronous>, transform_indices = @transform_3, window_bounds = array<i64: 1, 8>}, {pipeline_mode = #tpu.pipeline_mode<synchronous>, transform_indices = @transform_4, window_bounds = array<i64: 25, 1>}, {transform_indices = @transform_5, window_bounds = array<i64: 1, 8>}]} {
    %c0 = arith.constant 0 : index
    %c0_0 = arith.constant 0 : index
    %0 = vector.load %arg1[%c0, %c0_0] : memref<8x32xf32, #tpu.memory_space<vmem>>, vector<8x32xf32>
    %c0_1 = arith.constant 0 : index
    %c0_2 = arith.constant 0 : index
    %1 = vector.load %arg2[%c0_1, %c0_2] : memref<16x32xf32, #tpu.memory_space<vmem>>, vector<16x32xf32>
    %cst = arith.constant dense<0.000000e+00> : vector<16x8xf32>
    %2 = tpu.matmul %1, %0, %cst {dimension_numbers = #tpu.dot_dimension_numbers<[1], [1], [0], [0], [0, 0, 1, 0], [], []>} : vector<16x32xf32>, vector<8x32xf32>, vector<16x8xf32> -> vector<16x8xf32>
    %c0_3 = arith.constant 0 : index
    %c0_4 = arith.constant 0 : index
    %3 = vector.load %arg5[%c0_3, %c0_4] : memref<25x1xf32, #tpu.memory_space<vmem>>, vector<16x1xf32>
    %4 = vector.broadcast %3 : vector<16x1xf32> to vector<16x8xf32>
    %5 = arith.addf %2, %4 : vector<16x8xf32>
    %cst_5 = arith.constant 0.000000e+00 : f32
    %6 = vector.broadcast %cst_5 : f32 to vector<16x8xf32>
    %7 = arith.maximumf %5, %6 : vector<16x8xf32>
    %c0_6 = arith.constant 0 : index
    %c0_7 = arith.constant 0 : index
    %8 = vector.load %arg3[%c0_6, %c0_7] : memref<8x16xf32, #tpu.memory_space<vmem>>, vector<8x16xf32>
    %cst_8 = arith.constant dense<0.000000e+00> : vector<8x8xf32>
    %9 = tpu.matmul %8, %7, %cst_8 {dimension_numbers = #tpu.dot_dimension_numbers<[1], [0], [0], [1], [0, 0, 1, 1], [], []>} : vector<8x16xf32>, vector<16x8xf32>, vector<8x8xf32> -> vector<8x8xf32>
    %c16 = arith.constant 16 : index
    %c0_9 = arith.constant 0 : index
    %10 = vector.load %arg5[%c16, %c0_9] : memref<25x1xf32, #tpu.memory_space<vmem>>, vector<8x1xf32>
    %11 = vector.broadcast %10 : vector<8x1xf32> to vector<8x8xf32>
    %12 = arith.addf %9, %11 : vector<8x8xf32>
    %cst_10 = arith.constant 0.000000e+00 : f32
    %13 = vector.broadcast %cst_10 : f32 to vector<8x8xf32>
    %14 = arith.maximumf %12, %13 : vector<8x8xf32>
    %c0_11 = arith.constant 0 : index
    %c0_12 = arith.constant 0 : index
    %15 = vector.load %arg4[%c0_11, %c0_12] : memref<1x8xf32, #tpu.memory_space<vmem>>, vector<1x8xf32>
    %cst_13 = arith.constant dense<0.000000e+00> : vector<1x8xf32>
    %16 = tpu.matmul %15, %14, %cst_13 {dimension_numbers = #tpu.dot_dimension_numbers<[1], [0], [0], [1], [0, 0, 1, 1], [], []>} : vector<1x8xf32>, vector<8x8xf32>, vector<1x8xf32> -> vector<1x8xf32>
    %c24 = arith.constant 24 : index
    %c0_14 = arith.constant 0 : index
    %17 = vector.load %arg5[%c24, %c0_14] : memref<25x1xf32, #tpu.memory_space<vmem>>, vector<1x1xf32>
    %18 = vector.broadcast %17 : vector<1x1xf32> to vector<1x8xf32>
    %19 = arith.addf %16, %18 : vector<1x8xf32>
    %cst_15 = arith.constant 5.000000e-01 : f32
    %20 = vector.broadcast %cst_15 : f32 to vector<1x8xf32>
    %21 = arith.mulf %20, %19 : vector<1x8xf32>
    %22 = math.tanh %21 : vector<1x8xf32>
    %cst_16 = arith.constant 1.000000e+00 : f32
    %23 = vector.broadcast %cst_16 : f32 to vector<1x8xf32>
    %24 = arith.addf %22, %23 : vector<1x8xf32>
    %cst_17 = arith.constant 5.000000e-01 : f32
    %25 = vector.broadcast %cst_17 : f32 to vector<1x8xf32>
    %26 = arith.mulf %25, %24 : vector<1x8xf32>
    %c0_18 = arith.constant 0 : index
    %c0_19 = arith.constant 0 : index
    %27 = vector.load %arg6[%c0_18, %c0_19] : memref<1x8xf32, #tpu.memory_space<vmem>>, vector<1x8xf32>
    tpu.vector_store %arg6[%c0_18, %c0_19], %26 {strides = array<i32>} : memref<1x8xf32, #tpu.memory_space<vmem>>, vector<1x8xf32>,
    return
  }
  func.func @transform_0(%arg0: i32) -> (i32, i32) {
    %c0_i32 = arith.constant 0 : i32
    %c0_i32_0 = arith.constant 0 : i32
    return %arg0, %c0_i32 : i32, i32
  }
  func.func @transform_1(%arg0: i32) -> (i32, i32) {
    %c0_i32 = arith.constant 0 : i32
    %c0_i32_0 = arith.constant 0 : i32
    %c0_i32_1 = arith.constant 0 : i32
    return %c0_i32, %c0_i32_0 : i32, i32
  }
  func.func @transform_2(%arg0: i32) -> (i32, i32) {
    %c0_i32 = arith.constant 0 : i32
    %c0_i32_0 = arith.constant 0 : i32
    %c0_i32_1 = arith.constant 0 : i32
    return %c0_i32, %c0_i32_0 : i32, i32
  }
  func.func @transform_3(%arg0: i32) -> (i32, i32) {
    %c0_i32 = arith.constant 0 : i32
    %c0_i32_0 = arith.constant 0 : i32
    %c0_i32_1 = arith.constant 0 : i32
    return %c0_i32, %c0_i32_0 : i32, i32
  }
  func.func @transform_4(%arg0: i32) -> (i32, i32) {
    %c0_i32 = arith.constant 0 : i32
    %c0_i32_0 = arith.constant 0 : i32
    %c0_i32_1 = arith.constant 0 : i32
    return %c0_i32, %c0_i32_0 : i32, i32
  }
  func.func @transform_5(%arg0: i32) -> (i32, i32) {
    %c0_i32 = arith.constant 0 : i32
    %c0_i32_0 = arith.constant 0 : i32
    return %c0_i32, %arg0 : i32, i32
  }
}

</mosaic_0001>

<bundles_post_ra>
// kernel: tpu_custom_call.1
= control target key start
LH: loop header
LB: loop body
LE: loop exit
PB: predicated region body
PF: predicated region fallthrough
CT: control target
= control target key end

     0   :  { %vm36_vm0 = vcmask 261120   ;;  %s446_s0 = inlined_call_operand.vmem [shape: f32[8,32], index: 0, kind: input, shape index: {}]   ;;  %s447_s1 = inlined_call_operand.vmem [shape: f32[16,32], index: 1, kind: input, shape index: {}]   ;;  %s448_s2 = inlined_call_operand.vmem [shape: f32[8,16], index: 2, kind: input, shape index: {}]   ;;  %s449_s3 = inlined_call_operand.vmem [shape: f32[1,8], index: 3, kind: input, shape index: {}]   ;;  %s450_s4 = inlined_call_operand.vmem [shape: f32[25,1], index: 4, kind: input, shape index: {}]   ;;  %s451_s5 = inlined_call_operand.hbm [shape: f32[1,8], index: 5, kind: output, shape index: {}]  }
   0x1   :  { %v21_v0 = vld [vmem:[%s446_s0] sm:$0xff] }
   0x2   :  { %v22_v1 = vld [vmem:[%s447_s1] sm:$0xff]  ;;  %319 = vmatprep.subr.msk.mxu0 %vm36_vm0, %v21_v0 }
   0x3   :  { %321 = vmatprep.mubr.msk.f32.mxu0 %vm36_vm0, %v22_v1  ;;  %v24_v2 = vld [vmem:[%s450_s4] sm:$0xff] }
   0x4   :  { %10 = vsyncpa [#allocation3], 0  ;;  %320 = vmatpush3.xpose.msk.msra.mxu0 %vm36_vm0, %v21_v0  ;;  %v23_v3 = vld [vmem:[%s447_s1 + $0x8] sm:$0xff]  ;;  %v372_v4 = vmov 0   ;;  %v373_v6 = vmov 0.0|0.0   ;;  %vm374_vm1 = vmmov 0  }
   0x5   :  { %344 = vset.pattern.permute.xlu0 %v372_v4  ;;  %345 = vset.pattern.permute.xlu1 %v372_v4  ;;  %v25_v5 = vld [vmem:[%s450_s4 + $0x8] sm:$0xff]  ;;  %v375_v7 = vmov 0.0   ;;  %v124_v8 = vld [vmem:[%s450_s4 + $0x10] sm:$0xff]  ;;  %v206_v9 = vld [vmem:[%s450_s4 + $0x18] sm:$0x1]  ;;  %vm130_vm2 = vcmask 130048  }
   0x6   :  { %28 = vperm.xlu0 %344, %v24_v2   ;;  %336 = vmatprep.subr.bf16.mxu1 %v373_v6  ;;  %v123_v19 = vld [vmem:[%s448_s2] sm:$0xff]  ;;  %vm212_vm3 = vcmask 64512   ;;  %s376_s2 = smov [#allocation2]   ;;  %vm290_vm4 = vcmask 57344  }
   0x7   :  { %322 = vmatmul.mubr.msk.f32.vlgmr.msra.gmra.mrb[0].mxu0 %vm36_vm0, %v23_v3  ;;  %328 = vmatprep.mubr.msk.f32.mxu1 %vm374_vm1, %v375_v7  ;;  %v205_v25 = vld [vmem:[%s449_s3] sm:$0x1]  ;;  %s298_s8 = sshll.u32 %s376_s2, 4  ;;  %s299_s8 = int_to_ptr.vmem [resolvable:$true] %s298_s8 }
   0x8   :  { %331 = vmatprep.subr.mxu0 %v375_v7  ;;  %333 = vmatprep.mubr.msk.f32.mxu0 %vm374_vm1, %v375_v7  ;;  %s348_s9 = scalar_lea.vmem %s299_s8, 16  ;;  %s352_s3 = scalar_lea.vmem %s299_s8, 32 }
   0x9   :  { %127 = vperm.xlu1 %345, %v124_v8   ;;  %p349_p0 = scmp.ne.s32.totalorder %s299_s8, %s348_s9  ;;  %p353_p1 = scmp.lt.s32.totalorder %s299_s8, %s299_s8 }
   0xa   :  { %33 = vperm.xlu0 %344, %v25_v5   ;;  %p354_p2 = scmp.lt.s32.totalorder %s352_s3, %s348_s9 }
   0xc   :  { %p355_p3 = por %p354_p2, %p353_p1 }
   0xd   :  { %209 = vperm.xlu1 %345, %v206_v9  }
   0xe   :  { %p356_p4 = pnand %p355_p3, %p349_p0 }
  0x85   :  { %v29_v10 = vpop.permute.xlu0 %28 }
  0x88   :  { %v128_v20 = vpop.permute.xlu1 %127 }
  0x89   :  { %v34_v11 = vpop.permute.xlu0 %33 }
  0x8c   :  { %v210_v26 = vpop.permute.xlu1 %209 }
  0xda   :  { %v323_v12 = vpop.f32.mrb[0].mxu0 }
  0xdb   :  { %v118_v13 = vadd.f32 %v323_v12, %v34_v11  ;;  %v112_v14 = vpop.f32.mrb[1].mxu0 }
  0xdc   :  { %v113_v15 = vadd.f32 %v112_v14, %v29_v10 }
  0xdd   :  { %v122_v16 = vmax.f32 %v118_v13, 0.0 }
  0xde   :  { %v121_v17 = vmax.f32 %v113_v15, 0.0 }
  0xe0   :  { %v337_v18 = vpack.c.bf16 %v122_v16, %v121_v17 }
  0xe2   :  { %338 = vmatpush3.bf16.msra.mxu1 %v337_v18 }
  0xe5   :  { %329 = vmatmul.mubr.msk.f32.vlgmr.msra.gmra.mrb[0].mxu1 %vm130_vm2, %v123_v19 }
 0x1b8   :  { %v200_v21 = vpop.f32.mrb[0].mxu1 }
 0x1b9   :  { %v201_v22 = vadd.f32 %v200_v21, %v128_v20  ;;  %v330_v23 = vpop.f32.mrb[1].mxu1 }
 0x1bb   :  { %v204_v24 = vmax.f32 %v201_v22, 0.0 }
 0x1bd   :  { %332 = vmatpush3.msra.mxu0 %v204_v24 }
 0x1be   :  { %334 = vmatmul.mubr.msk.f32.vlgmr.msra.gmra.mrb[2].mxu0 %vm212_vm3, %v205_v25 }
 0x291   :  { %v282_v27 = vpop.f32.mrb[2].mxu0 }
 0x292   :  { %v283_v28 = vadd.f32 %v282_v27, %v210_v26  ;;  %v335_v29 = vpop.f32.mrb[3].mxu0 }
 0x294   :  { %v286_v30 = vmul.f32 0.5, %v283_v28 }
 0x296   :  { %346 = vtanh.f32 %v286_v30 }
 0x2a0   :  { %v347_v31 = vpop.eup %346 }
 0x2a1   :  { %v288_v32 = vadd.f32 1.0, %v347_v31 }
 0x2a3   :  { %v289_v33 = vmul.f32 0.5, %v288_v32 }
 0x2a5   :  { %291 = vst.msk [vmem:[#allocation2] sm:$0x1] %vm290_vm4, %v289_v33 }
 0x2a6   :  { %359 = shalt.err (!%p356_p4)
}
 0x2a7   :  { %s360_s12 = scalar_lea.hbm %s451_s5, 16 }
 0x2a8   :  { %p361_p5 = scmp.ne.s32.totalorder %s451_s5, %s360_s12  ;;  %p364_p6 = scmp.lt.u32.totalorder %s360_s12, %s451_s5 }
 0x2aa   :  { %p366_p7 = pnand %p364_p6, %p361_p5 }
 0x2ac   :  { %369 = shalt.err (!%p366_p7)
}
 0x2ad   :  { %301 = dma.vmem_to_hbm [thread:$0]  %s299_s8, 16, %s451_s5, [#allocation3]  }
 0x2ae   :  { %370 = dma.done.wait [#allocation3], 16  }
 0x2af   :  { %371 = vsyncadd [#allocation3], 4294967280 }
 0x2b0   :  { %305 = vsyncpa [#allocation3], 1 }

</bundles_post_ra>
